<compile_context>
chip_gen: v7x
topology: tpu7x:2x2x1
jax: 0.10.0
libtpu: 0.0.40
codegen_flags: <defaults>
</compile_context>

<pallas_src>
import functools

import jax
import jax.numpy as jnp
from jax.experimental import pallas as pl
from jax.experimental.pallas import tpu as pltpu

# The 24 offsets of the 5x5 census window (center (2, 2) excluded), in the
# exact order used by the PyTorch module (first offset ends up in the MSB).
_OFFSETS = [(0, 0), (1, 0), (2, 0), (3, 0), (4, 0),
            (0, 1), (1, 1), (2, 1), (3, 1), (4, 1),
            (0, 2), (1, 2), (3, 2), (4, 2),
            (0, 3), (1, 3), (2, 3), (3, 3), (4, 3),
            (0, 4), (1, 4), (2, 4), (3, 4), (4, 4)]
_MARGIN = 2  # kernel_size = 5


def _census_kernel(mask_ref, img_ref, out_ref, *, w):
    """mask_ref: (1, L) int32; img_ref: (TB, L) float; out_ref: (TB, L) int32."""
    x = img_ref[...]                      # (TB, L)
    l = x.shape[-1]
    code = jnp.zeros(x.shape, jnp.int32)
    for i, (u, v) in enumerate(_OFFSETS):
        # Neighbour of flat pixel p (= y*W + x) lives at p + dv*W + du.
        k = (v - _MARGIN) * w + (u - _MARGIN)
        s = (-k) % l                      # pltpu.roll: out[p] = in[(p - s) % L]
        nbr = x if s == 0 else pltpu.roll(x, shift=s, axis=1)
        bit = jnp.where(nbr >= x, jnp.int32(1 << (23 - i)), jnp.int32(0))
        code = code + bit
    # Zero the 2-pixel border (also kills any roll wrap-around contamination).
    out_ref[...] = jnp.where(mask_ref[...] != 0, code, jnp.int32(0))


def census_transform_pallas(img, kernel_size=5, *, vmem_block_budget=8 << 20):
    if kernel_size not in (3, 5):
        raise NotImplementedError
    if kernel_size != 5:
        # TODO(synk): the reference offsets are hard-coded for a 5x5 window;
        # kernel_size=3 would index out of bounds in the PyTorch module as well,
        # so only kernel_size=5 is implemented here.
        raise NotImplementedError("only kernel_size=5 is supported")
    assert img.ndim == 4
    n, c, h, w = img.shape
    m, l = n * c, h * w

    x = img.reshape(m, l)

    # Interior-validity mask (border of width 2 is zero), lane-flattened.
    yy = jnp.arange(h)[:, None]
    xx = jnp.arange(w)[None, :]
    valid = ((yy >= _MARGIN) & (yy < h - _MARGIN)
             & (xx >= _MARGIN) & (xx < w - _MARGIN))
    mask = valid.reshape(1, l).astype(jnp.int32)

    # Row tiling: pad rows to a multiple of 8 (sublane), then grow the tile
    # while it divides the padded row count and the double-buffered
    # (input + int32 output) blocks stay within a conservative VMEM budget.
    m_pad = ((m + 7) // 8) * 8
    if m_pad != m:
        x = jnp.pad(x, ((0, m_pad - m), (0, 0)))
    tb = 8
    bytes_per_row = l * (x.dtype.itemsize + 4) * 2  # in + out, double-buffered
    while (tb * 2 <= m_pad and m_pad % (tb * 2) == 0
           and tb * 2 * bytes_per_row <= vmem_block_budget):
        tb *= 2
    grid = (m_pad // tb,)

    out = pl.pallas_call(
        functools.partial(_census_kernel, w=w),
        out_shape=jax.ShapeDtypeStruct((m_pad, l), jnp.int32),
        grid=grid,
        in_specs=[
            pl.BlockSpec((1, l), lambda i: (0, 0)),    # mask (tiny, constant)
            pl.BlockSpec((tb, l), lambda i: (i, 0)),   # image rows
        ],
        out_specs=pl.BlockSpec((tb, l), lambda i: (i, 0)),
        compiler_params=pltpu.CompilerParams(dimension_semantics=("parallel",)),
    )(mask, x)

    # Free reshape back to NCHW (no transpose needed).
    return out[:m].reshape(n, c, h, w)


def census_transform_ref(img, kernel_size=5):
    """Plain-JAX mirror of the PyTorch forward, for verification."""
    n, c, h, w = img.shape
    margin = (kernel_size - 1) // 2
    hv, wv = h - kernel_size + 1, w - kernel_size + 1
    center = img[:, :, margin:h - margin, margin:w - margin]
    census = jnp.zeros((n, c, hv, wv), jnp.int32)
    for (u, v) in _OFFSETS:
        census = census * 2 + (img[:, :, v:v + hv, u:u + wv] >= center).astype(jnp.int32)
    return jnp.pad(census, ((0, 0), (0, 0), (margin, margin), (margin, margin)))


if __name__ == "__main__":
    key = jax.random.PRNGKey(0)

    N, C, H, W = 2, 4, 16, 16
    img = jax.random.uniform(key, (N, C, H, W), dtype=jnp.float32)

    out = census_transform_pallas(img, kernel_size=5)
    out = jax.block_until_ready(out)

    ref = census_transform_ref(img, kernel_size=5)
    assert out.shape == (N, C, H, W), out.shape
    assert out.dtype == jnp.int32, out.dtype
    assert jnp.array_equal(out, ref), "Pallas output does not match reference"

    print("KERNEL_OK")
</pallas_src>

<mosaic_0001>
module attributes {stable_mosaic.version = 11 : i64} {
  func.func @_census_kernel(%arg0: i32, %arg1: memref<1x256xi32, #tpu.memory_space<vmem>>, %arg2: memref<8x256xf32, #tpu.memory_space<vmem>>, %arg3: memref<8x256xi32, #tpu.memory_space<vmem>>) attributes {dimension_semantics = [#tpu.dimension_semantics<parallel>], iteration_bounds = array<i64: 1>, scalar_prefetch = 0 : i64, scratch_operands = 0 : i64, tpu.core_type = #tpu.core_type<tc>, window_params = [{pipeline_mode = #tpu.pipeline_mode<synchronous>, transform_indices = @transform_0, window_bounds = array<i64: 1, 256>}, {transform_indices = @transform_1, window_bounds = array<i64: 8, 256>}, {transform_indices = @transform_2, window_bounds = array<i64: 8, 256>}]} {
    %c0 = arith.constant 0 : index
    %c0_0 = arith.constant 0 : index
    %0 = vector.load %arg2[%c0, %c0_0] : memref<8x256xf32, #tpu.memory_space<vmem>>, vector<8x256xf32>
    %c0_i32 = arith.constant 0 : i32
    %1 = vector.broadcast %c0_i32 : i32 to vector<8x256xi32>
    %c34_i32 = arith.constant 34 : i32
    %2 = tpu.dynamic_rotate %0 by %c34_i32 dim 1 : vector<8x256xf32>, i32 -> vector<8x256xf32>
    %3 = arith.cmpf oge, %2, %0 : vector<8x256xf32>
    %c8388608_i32 = arith.constant 8388608 : i32
    %c0_i32_1 = arith.constant 0 : i32
    %4 = vector.broadcast %c8388608_i32 : i32 to vector<8x256xi32>
    %5 = vector.broadcast %c0_i32_1 : i32 to vector<8x256xi32>
    %6 = arith.select %3, %4, %5 : vector<8x256xi1>, vector<8x256xi32>
    %7 = arith.addi %1, %6 : vector<8x256xi32>
    %c33_i32 = arith.constant 33 : i32
    %8 = tpu.dynamic_rotate %0 by %c33_i32 dim 1 : vector<8x256xf32>, i32 -> vector<8x256xf32>
    %9 = arith.cmpf oge, %8, %0 : vector<8x256xf32>
    %c4194304_i32 = arith.constant 4194304 : i32
    %c0_i32_2 = arith.constant 0 : i32
    %10 = vector.broadcast %c4194304_i32 : i32 to vector<8x256xi32>
    %11 = vector.broadcast %c0_i32_2 : i32 to vector<8x256xi32>
    %12 = arith.select %9, %10, %11 : vector<8x256xi1>, vector<8x256xi32>
    %13 = arith.addi %7, %12 : vector<8x256xi32>
    %c32_i32 = arith.constant 32 : i32
    %14 = tpu.dynamic_rotate %0 by %c32_i32 dim 1 : vector<8x256xf32>, i32 -> vector<8x256xf32>
    %15 = arith.cmpf oge, %14, %0 : vector<8x256xf32>
    %c2097152_i32 = arith.constant 2097152 : i32
    %c0_i32_3 = arith.constant 0 : i32
    %16 = vector.broadcast %c2097152_i32 : i32 to vector<8x256xi32>
    %17 = vector.broadcast %c0_i32_3 : i32 to vector<8x256xi32>
    %18 = arith.select %15, %16, %17 : vector<8x256xi1>, vector<8x256xi32>
    %19 = arith.addi %13, %18 : vector<8x256xi32>
    %c31_i32 = arith.constant 31 : i32
    %20 = tpu.dynamic_rotate %0 by %c31_i32 dim 1 : vector<8x256xf32>, i32 -> vector<8x256xf32>
    %21 = arith.cmpf oge, %20, %0 : vector<8x256xf32>
    %c1048576_i32 = arith.constant 1048576 : i32
    %c0_i32_4 = arith.constant 0 : i32
    %22 = vector.broadcast %c1048576_i32 : i32 to vector<8x256xi32>
    %23 = vector.broadcast %c0_i32_4 : i32 to vector<8x256xi32>
    %24 = arith.select %21, %22, %23 : vector<8x256xi1>, vector<8x256xi32>
    %25 = arith.addi %19, %24 : vector<8x256xi32>
    %c30_i32 = arith.constant 30 : i32
    %26 = tpu.dynamic_rotate %0 by %c30_i32 dim 1 : vector<8x256xf32>, i32 -> vector<8x256xf32>
    %27 = arith.cmpf oge, %26, %0 : vector<8x256xf32>
    %c524288_i32 = arith.constant 524288 : i32
    %c0_i32_5 = arith.constant 0 : i32
    %28 = vector.broadcast %c524288_i32 : i32 to vector<8x256xi32>
    %29 = vector.broadcast %c0_i32_5 : i32 to vector<8x256xi32>
    %30 = arith.select %27, %28, %29 : vector<8x256xi1>, vector<8x256xi32>
    %31 = arith.addi %25, %30 : vector<8x256xi32>
    %c18_i32 = arith.constant 18 : i32
    %32 = tpu.dynamic_rotate %0 by %c18_i32 dim 1 : vector<8x256xf32>, i32 -> vector<8x256xf32>
    %33 = arith.cmpf oge, %32, %0 : vector<8x256xf32>
    %c262144_i32 = arith.constant 262144 : i32
    %c0_i32_6 = arith.constant 0 : i32
    %34 = vector.broadcast %c262144_i32 : i32 to vector<8x256xi32>
    %35 = vector.broadcast %c0_i32_6 : i32 to vector<8x256xi32>
    %36 = arith.select %33, %34, %35 : vector<8x256xi1>, vector<8x256xi32>
    %37 = arith.addi %31, %36 : vector<8x256xi32>
    %c17_i32 = arith.constant 17 : i32
    %38 = tpu.dynamic_rotate %0 by %c17_i32 dim 1 : vector<8x256xf32>, i32 -> vector<8x256xf32>
    %39 = arith.cmpf oge, %38, %0 : vector<8x256xf32>
    %c131072_i32 = arith.constant 131072 : i32
    %c0_i32_7 = arith.constant 0 : i32
    %40 = vector.broadcast %c131072_i32 : i32 to vector<8x256xi32>
    %41 = vector.broadcast %c0_i32_7 : i32 to vector<8x256xi32>
    %42 = arith.select %39, %40, %41 : vector<8x256xi1>, vector<8x256xi32>
    %43 = arith.addi %37, %42 : vector<8x256xi32>
    %c16_i32 = arith.constant 16 : i32
    %44 = tpu.dynamic_rotate %0 by %c16_i32 dim 1 : vector<8x256xf32>, i32 -> vector<8x256xf32>
    %45 = arith.cmpf oge, %44, %0 : vector<8x256xf32>
    %c65536_i32 = arith.constant 65536 : i32
    %c0_i32_8 = arith.constant 0 : i32
    %46 = vector.broadcast %c65536_i32 : i32 to vector<8x256xi32>
    %47 = vector.broadcast %c0_i32_8 : i32 to vector<8x256xi32>
    %48 = arith.select %45, %46, %47 : vector<8x256xi1>, vector<8x256xi32>
    %49 = arith.addi %43, %48 : vector<8x256xi32>
    %c15_i32 = arith.constant 15 : i32
    %50 = tpu.dynamic_rotate %0 by %c15_i32 dim 1 : vector<8x256xf32>, i32 -> vector<8x256xf32>
    %51 = arith.cmpf oge, %50, %0 : vector<8x256xf32>
    %c32768_i32 = arith.constant 32768 : i32
    %c0_i32_9 = arith.constant 0 : i32
    %52 = vector.broadcast %c32768_i32 : i32 to vector<8x256xi32>
    %53 = vector.broadcast %c0_i32_9 : i32 to vector<8x256xi32>
    %54 = arith.select %51, %52, %53 : vector<8x256xi1>, vector<8x256xi32>
    %55 = arith.addi %49, %54 : vector<8x256xi32>
    %c14_i32 = arith.constant 14 : i32
    %56 = tpu.dynamic_rotate %0 by %c14_i32 dim 1 : vector<8x256xf32>, i32 -> vector<8x256xf32>
    %57 = arith.cmpf oge, %56, %0 : vector<8x256xf32>
    %c16384_i32 = arith.constant 16384 : i32
    %c0_i32_10 = arith.constant 0 : i32
    %58 = vector.broadcast %c16384_i32 : i32 to vector<8x256xi32>
    %59 = vector.broadcast %c0_i32_10 : i32 to vector<8x256xi32>
    %60 = arith.select %57, %58, %59 : vector<8x256xi1>, vector<8x256xi32>
    %61 = arith.addi %55, %60 : vector<8x256xi32>
    %c2_i32 = arith.constant 2 : i32
    %62 = tpu.dynamic_rotate %0 by %c2_i32 dim 1 : vector<8x256xf32>, i32 -> vector<8x256xf32>
    %63 = arith.cmpf oge, %62, %0 : vector<8x256xf32>
    %c8192_i32 = arith.constant 8192 : i32
    %c0_i32_11 = arith.constant 0 : i32
    %64 = vector.broadcast %c8192_i32 : i32 to vector<8x256xi32>
    %65 = vector.broadcast %c0_i32_11 : i32 to vector<8x256xi32>
    %66 = arith.select %63, %64, %65 : vector<8x256xi1>, vector<8x256xi32>
    %67 = arith.addi %61, %66 : vector<8x256xi32>
    %c1_i32 = arith.constant 1 : i32
    %68 = tpu.dynamic_rotate %0 by %c1_i32 dim 1 : vector<8x256xf32>, i32 -> vector<8x256xf32>
    %69 = arith.cmpf oge, %68, %0 : vector<8x256xf32>
    %c4096_i32 = arith.constant 4096 : i32
    %c0_i32_12 = arith.constant 0 : i32
    %70 = vector.broadcast %c4096_i32 : i32 to vector<8x256xi32>
    %71 = vector.broadcast %c0_i32_12 : i32 to vector<8x256xi32>
    %72 = arith.select %69, %70, %71 : vector<8x256xi1>, vector<8x256xi32>
    %73 = arith.addi %67, %72 : vector<8x256xi32>
    %c255_i32 = arith.constant 255 : i32
    %74 = tpu.dynamic_rotate %0 by %c255_i32 dim 1 : vector<8x256xf32>, i32 -> vector<8x256xf32>
    %75 = arith.cmpf oge, %74, %0 : vector<8x256xf32>
    %c2048_i32 = arith.constant 2048 : i32
    %c0_i32_13 = arith.constant 0 : i32
    %76 = vector.broadcast %c2048_i32 : i32 to vector<8x256xi32>
    %77 = vector.broadcast %c0_i32_13 : i32 to vector<8x256xi32>
    %78 = arith.select %75, %76, %77 : vector<8x256xi1>, vector<8x256xi32>
    %79 = arith.addi %73, %78 : vector<8x256xi32>
    %c254_i32 = arith.constant 254 : i32
    %80 = tpu.dynamic_rotate %0 by %c254_i32 dim 1 : vector<8x256xf32>, i32 -> vector<8x256xf32>
    %81 = arith.cmpf oge, %80, %0 : vector<8x256xf32>
    %c1024_i32 = arith.constant 1024 : i32
    %c0_i32_14 = arith.constant 0 : i32
    %82 = vector.broadcast %c1024_i32 : i32 to vector<8x256xi32>
    %83 = vector.broadcast %c0_i32_14 : i32 to vector<8x256xi32>
    %84 = arith.select %81, %82, %83 : vector<8x256xi1>, vector<8x256xi32>
    %85 = arith.addi %79, %84 : vector<8x256xi32>
    %c242_i32 = arith.constant 242 : i32
    %86 = tpu.dynamic_rotate %0 by %c242_i32 dim 1 : vector<8x256xf32>, i32 -> vector<8x256xf32>
    %87 = arith.cmpf oge, %86, %0 : vector<8x256xf32>
    %c512_i32 = arith.constant 512 : i32
    %c0_i32_15 = arith.constant 0 : i32
    %88 = vector.broadcast %c512_i32 : i32 to vector<8x256xi32>
    %89 = vector.broadcast %c0_i32_15 : i32 to vector<8x256xi32>
    %90 = arith.select %87, %88, %89 : vector<8x256xi1>, vector<8x256xi32>
    %91 = arith.addi %85, %90 : vector<8x256xi32>
    %c241_i32 = arith.constant 241 : i32
    %92 = tpu.dynamic_rotate %0 by %c241_i32 dim 1 : vector<8x256xf32>, i32 -> vector<8x256xf32>
    %93 = arith.cmpf oge, %92, %0 : vector<8x256xf32>
    %c256_i32 = arith.constant 256 : i32
    %c0_i32_16 = arith.constant 0 : i32
    %94 = vector.broadcast %c256_i32 : i32 to vector<8x256xi32>
    %95 = vector.broadcast %c0_i32_16 : i32 to vector<8x256xi32>
    %96 = arith.select %93, %94, %95 : vector<8x256xi1>, vector<8x256xi32>
    %97 = arith.addi %91, %96 : vector<8x256xi32>
    %c240_i32 = arith.constant 240 : i32
    %98 = tpu.dynamic_rotate %0 by %c240_i32 dim 1 : vector<8x256xf32>, i32 -> vector<8x256xf32>
    %99 = arith.cmpf oge, %98, %0 : vector<8x256xf32>
    %c128_i32 = arith.constant 128 : i32
    %c0_i32_17 = arith.constant 0 : i32
    %100 = vector.broadcast %c128_i32 : i32 to vector<8x256xi32>
    %101 = vector.broadcast %c0_i32_17 : i32 to vector<8x256xi32>
    %102 = arith.select %99, %100, %101 : vector<8x256xi1>, vector<8x256xi32>
    %103 = arith.addi %97, %102 : vector<8x256xi32>
    %c239_i32 = arith.constant 239 : i32
    %104 = tpu.dynamic_rotate %0 by %c239_i32 dim 1 : vector<8x256xf32>, i32 -> vector<8x256xf32>
    %105 = arith.cmpf oge, %104, %0 : vector<8x256xf32>
    %c64_i32 = arith.constant 64 : i32
    %c0_i32_18 = arith.constant 0 : i32
    %106 = vector.broadcast %c64_i32 : i32 to vector<8x256xi32>
    %107 = vector.broadcast %c0_i32_18 : i32 to vector<8x256xi32>
    %108 = arith.select %105, %106, %107 : vector<8x256xi1>, vector<8x256xi32>
    %109 = arith.addi %103, %108 : vector<8x256xi32>
    %c238_i32 = arith.constant 238 : i32
    %110 = tpu.dynamic_rotate %0 by %c238_i32 dim 1 : vector<8x256xf32>, i32 -> vector<8x256xf32>
    %111 = arith.cmpf oge, %110, %0 : vector<8x256xf32>
    %c32_i32_19 = arith.constant 32 : i32
    %c0_i32_20 = arith.constant 0 : i32
    %112 = vector.broadcast %c32_i32_19 : i32 to vector<8x256xi32>
    %113 = vector.broadcast %c0_i32_20 : i32 to vector<8x256xi32>
    %114 = arith.select %111, %112, %113 : vector<8x256xi1>, vector<8x256xi32>
    %115 = arith.addi %109, %114 : vector<8x256xi32>
    %c226_i32 = arith.constant 226 : i32
    %116 = tpu.dynamic_rotate %0 by %c226_i32 dim 1 : vector<8x256xf32>, i32 -> vector<8x256xf32>
    %117 = arith.cmpf oge, %116, %0 : vector<8x256xf32>
    %c16_i32_21 = arith.constant 16 : i32
    %c0_i32_22 = arith.constant 0 : i32
    %118 = vector.broadcast %c16_i32_21 : i32 to vector<8x256xi32>
    %119 = vector.broadcast %c0_i32_22 : i32 to vector<8x256xi32>
    %120 = arith.select %117, %118, %119 : vector<8x256xi1>, vector<8x256xi32>
    %121 = arith.addi %115, %120 : vector<8x256xi32>
    %c225_i32 = arith.constant 225 : i32
    %122 = tpu.dynamic_rotate %0 by %c225_i32 dim 1 : vector<8x256xf32>, i32 -> vector<8x256xf32>
    %123 = arith.cmpf oge, %122, %0 : vector<8x256xf32>
    %c8_i32 = arith.constant 8 : i32
    %c0_i32_23 = arith.constant 0 : i32
    %124 = vector.broadcast %c8_i32 : i32 to vector<8x256xi32>
    %125 = vector.broadcast %c0_i32_23 : i32 to vector<8x256xi32>
    %126 = arith.select %123, %124, %125 : vector<8x256xi1>, vector<8x256xi32>
    %127 = arith.addi %121, %126 : vector<8x256xi32>
    %c224_i32 = arith.constant 224 : i32
    %128 = tpu.dynamic_rotate %0 by %c224_i32 dim 1 : vector<8x256xf32>, i32 -> vector<8x256xf32>
    %129 = arith.cmpf oge, %128, %0 : vector<8x256xf32>
    %c4_i32 = arith.constant 4 : i32
    %c0_i32_24 = arith.constant 0 : i32
    %130 = vector.broadcast %c4_i32 : i32 to vector<8x256xi32>
    %131 = vector.broadcast %c0_i32_24 : i32 to vector<8x256xi32>
    %132 = arith.select %129, %130, %131 : vector<8x256xi1>, vector<8x256xi32>
    %133 = arith.addi %127, %132 : vector<8x256xi32>
    %c223_i32 = arith.constant 223 : i32
    %134 = tpu.dynamic_rotate %0 by %c223_i32 dim 1 : vector<8x256xf32>, i32 -> vector<8x256xf32>
    %135 = arith.cmpf oge, %134, %0 : vector<8x256xf32>
    %c2_i32_25 = arith.constant 2 : i32
    %c0_i32_26 = arith.constant 0 : i32
    %136 = vector.broadcast %c2_i32_25 : i32 to vector<8x256xi32>
    %137 = vector.broadcast %c0_i32_26 : i32 to vector<8x256xi32>
    %138 = arith.select %135, %136, %137 : vector<8x256xi1>, vector<8x256xi32>
    %139 = arith.addi %133, %138 : vector<8x256xi32>
    %c222_i32 = arith.constant 222 : i32
    %140 = tpu.dynamic_rotate %0 by %c222_i32 dim 1 : vector<8x256xf32>, i32 -> vector<8x256xf32>
    %141 = arith.cmpf oge, %140, %0 : vector<8x256xf32>
    %c1_i32_27 = arith.constant 1 : i32
    %c0_i32_28 = arith.constant 0 : i32
    %142 = vector.broadcast %c1_i32_27 : i32 to vector<8x256xi32>
    %143 = vector.broadcast %c0_i32_28 : i32 to vector<8x256xi32>
    %144 = arith.select %141, %142, %143 : vector<8x256xi1>, vector<8x256xi32>
    %145 = arith.addi %139, %144 : vector<8x256xi32>
    %c0_29 = arith.constant 0 : index
    %c0_30 = arith.constant 0 : index
    %146 = vector.load %arg1[%c0_29, %c0_30] : memref<1x256xi32, #tpu.memory_space<vmem>>, vector<1x256xi32>
    %c0_i32_31 = arith.constant 0 : i32
    %147 = vector.broadcast %c0_i32_31 : i32 to vector<1x256xi32>
    %148 = arith.cmpi ne, %146, %147 : vector<1x256xi32>
    %c0_i32_32 = arith.constant 0 : i32
    %149 = vector.shape_cast %148 : vector<1x256xi1> to vector<1x256xi1>
    %150 = vector.broadcast %149 : vector<1x256xi1> to vector<8x256xi1>
    %151 = vector.broadcast %c0_i32_32 : i32 to vector<8x256xi32>
    %152 = arith.select %150, %145, %151 : vector<8x256xi1>, vector<8x256xi32>
    %c0_33 = arith.constant 0 : index
    %c0_34 = arith.constant 0 : index
    %153 = vector.load %arg3[%c0_33, %c0_34] : memref<8x256xi32, #tpu.memory_space<vmem>>, vector<8x256xi32>
    tpu.vector_store %arg3[%c0_33, %c0_34], %152 {strides = array<i32>} : memref<8x256xi32, #tpu.memory_space<vmem>>, vector<8x256xi32>,
    return
  }
  func.func @transform_0(%arg0: i32) -> (i32, i32) {
    %c0_i32 = arith.constant 0 : i32
    %c0_i32_0 = arith.constant 0 : i32
    %c0_i32_1 = arith.constant 0 : i32
    return %c0_i32, %c0_i32_0 : i32, i32
  }
  func.func @transform_1(%arg0: i32) -> (i32, i32) {
    %c0_i32 = arith.constant 0 : i32
    %c0_i32_0 = arith.constant 0 : i32
    return %arg0, %c0_i32 : i32, i32
  }
  func.func @transform_2(%arg0: i32) -> (i32, i32) {
    %c0_i32 = arith.constant 0 : i32
    %c0_i32_0 = arith.constant 0 : i32
    return %arg0, %c0_i32 : i32, i32
  }
}

</mosaic_0001>

<bundles_post_ra>
// kernel: tpu_custom_call.1
= control target key start
LH: loop header
LB: loop body
LE: loop exit
PB: predicated region body
PF: predicated region fallthrough
CT: control target
= control target key end

     0   :  { %7 = vsyncpa [#allocation3], 0  ;;  %s892_s0 = inlined_call_operand.hbm [shape: s32[1,256], index: 0, kind: input, shape index: {}]   ;;  %s893_s1 = inlined_call_operand.hbm [shape: f32[8,256], index: 1, kind: input, shape index: {}]   ;;  %s894_s2 = inlined_call_operand.hbm [shape: s32[8,256], index: 2, kind: output, shape index: {}]  }
   0x1   :  { %8 = vsyncpa [#allocation6], 0 }
   0x2   :  { %9 = vsyncpa [#allocation4], 0  ;;  %s483_s9 = smov [#allocation2]   ;;  %s484_s11 = smov [#allocation5]  }
   0x3   :  { %s16_s10 = sshll.u32 %s483_s9, 4  ;;  %s26_s12 = sshll.u32 %s484_s11, 4  ;;  %s17_s10 = int_to_ptr.vmem [resolvable:$true] %s16_s10  ;;  %s27_s12 = int_to_ptr.vmem [resolvable:$true] %s26_s12 }
   0x4   :  { %s411_s15 = scalar_lea.hbm %s892_s0, 32 }
   0x5   :  { %p412_p0 = scmp.ne.s32.totalorder %s892_s0, %s411_s15  ;;  %p415_p1 = scmp.lt.u32.totalorder %s411_s15, %s892_s0 }
   0x7   :  { %p417_p2 = pnand %p415_p1, %p412_p0 }
   0x9   :  { %420 = shalt.err (!%p417_p2)
}
   0xa   :  { %s421_s20 = scalar_lea.vmem %s17_s10, 32  ;;  %p426_p4 = scmp.lt.s32.totalorder %s17_s10, %s17_s10 }
   0xb   :  { %p422_p3 = scmp.ne.s32.totalorder %s17_s10, %s421_s20  ;;  %p427_p5 = scmp.lt.s32.totalorder %s421_s20, %s421_s20 }
   0xd   :  { %p428_p6 = por %p427_p5, %p426_p4 }
   0xf   :  { %p429_p7 = pnand %p428_p6, %p422_p3 }
  0x11   :  { %432 = shalt.err (!%p429_p7)
}
  0x12   :  { %19 = dma.hbm_to_vmem [thread:$0]  %s892_s0, 32, %s17_s10, [#allocation3]  }
  0x13   :  { %s433_s25 = scalar_lea.hbm %s893_s1, 256 }
  0x14   :  { %p434_p8 = scmp.ne.s32.totalorder %s893_s1, %s433_s25  ;;  %p437_p9 = scmp.lt.u32.totalorder %s433_s25, %s893_s1 }
  0x16   :  { %p439_p10 = pnand %p437_p9, %p434_p8 }
  0x18   :  { %442 = shalt.err (!%p439_p10)
}
  0x19   :  { %s443_s30 = scalar_lea.vmem %s27_s12, 256  ;;  %p448_p12 = scmp.lt.s32.totalorder %s27_s12, %s27_s12 }
  0x1a   :  { %p444_p11 = scmp.ne.s32.totalorder %s27_s12, %s443_s30  ;;  %p449_p13 = scmp.lt.s32.totalorder %s443_s30, %s443_s30 }
  0x1c   :  { %p450_p0 = por %p449_p13, %p448_p12 }
  0x1e   :  { %p451_p1 = pnand %p450_p0, %p444_p11 }
  0x20   :  { %454 = shalt.err (!%p451_p1)
}
  0x21   :  { %29 = dma.hbm_to_vmem [thread:$0]  %s893_s1, 256, %s27_s12, [#allocation6]  }
  0x22   :  { %477 = dma.done.wait [#allocation3], 32  }
  0x23   :  { %478 = vsyncadd [#allocation3], 4294967264 }
  0x24   :  { %479 = dma.done.wait [#allocation6], 256  }
  0x25   :  { %480 = vsyncadd [#allocation6], 4294967040  ;;  %v550_v0 = vld [vmem:[#allocation5] sm:$0xff]  ;;  %s485_s4 = smov 33   ;;  %s486_s5 = smov 34   ;;  %v554_v1 = vld [vmem:[#allocation5 + $0x8] sm:$0xff]  ;;  %v42_v18 = vlaneseq }
  0x26   :  { %51 = vrot.lane.b32.xlu1 %v550_v0, %s485_s4  ;;  %38 = vrot.lane.b32.xlu0 %v550_v0, %s486_s5  ;;  %s487_s6 = smov 32   ;;  %s488_s1 = smov 31   ;;  %v509_v36 = vmov 0  }
  0x27   :  { %s489_s7 = smov 30   ;;  %s490_s8 = smov 18   ;;  %v615_v21 = vand.u32 127, %v42_v18 }
  0x28   :  { %s491_s9 = smov 17   ;;  %s492_s10 = smov 16  }
  0x29   :  { %s493_s11 = smov 15   ;;  %s494_s12 = smov 14   ;;  %vm55_vm0 = vcmp.lt.s32.totalorder %v615_v21, 33  ;;  %vm44_vm1 = vcmp.lt.s32.totalorder %v615_v21, 34  ;;  %vm68_vm2 = vcmp.lt.s32.totalorder %v615_v21, 32  ;;  %vm81_vm3 = vcmp.lt.s32.totalorder %v615_v21, 31 }
  0x2a   :  { %53 = vrot.lane.b32.xlu1 %v554_v1, %s485_s4  ;;  %40 = vrot.lane.b32.xlu0 %v554_v1, %s486_s5  ;;  %s495_s13 = smov 2   ;;  %s496_s14 = smov 1   ;;  %vm94_vm4 = vcmp.lt.s32.totalorder %v615_v21, 30  ;;  %vm107_vm9 = vcmp.lt.s32.totalorder %v615_v21, 18  ;;  %vm120_vm10 = vcmp.lt.s32.totalorder %v615_v21, 17  ;;  %vm133_vm11 = vcmp.lt.s32.totalorder %v615_v21, 16 }
  0x2b   :  { %s497_s15 = smov 127   ;;  %s498_s16 = smov 126   ;;  %vm146_vm12 = vcmp.lt.s32.totalorder %v615_v21, 15 }
  0x2c   :  { %s499_s17 = smov 114   ;;  %s500_s18 = smov 113  }
  0x2d   :  { %s501_s19 = smov 112   ;;  %s502_s20 = smov 111  }
  0x2e   :  { %66 = vrot.lane.b32.xlu1 %v554_v1, %s487_s6  ;;  %64 = vrot.lane.b32.xlu0 %v550_v0, %s487_s6  ;;  %s503_s21 = smov 110   ;;  %s504_s22 = smov 98  }
  0x2f   :  { %s505_s23 = smov 97   ;;  %s506_s24 = smov 96  }
  0x30   :  { %s507_s25 = smov 95   ;;  %s508_s26 = smov 94  }
  0x31   :  { %s510_s27 = smov [#allocation7]  }
  0x32   :  { %79 = vrot.lane.b32.xlu1 %v554_v1, %s488_s1  ;;  %77 = vrot.lane.b32.xlu0 %v550_v0, %s488_s1  ;;  %s373_s28 = sshll.u32 %s510_s27, 4  ;;  %s374_s28 = int_to_ptr.vmem [resolvable:$true] %s373_s28 }
  0x33   :  { %s455_s29 = scalar_lea.vmem %s374_s28, 256  ;;  %p460_p3 = scmp.lt.s32.totalorder %s374_s28, %s374_s28 }
  0x34   :  { %p456_p2 = scmp.ne.s32.totalorder %s374_s28, %s455_s29  ;;  %p461_p4 = scmp.lt.s32.totalorder %s455_s29, %s455_s29 }
  0x36   :  { %92 = vrot.lane.b32.xlu1 %v554_v1, %s489_s7  ;;  %90 = vrot.lane.b32.xlu0 %v550_v0, %s489_s7  ;;  %p462_p5 = por %p461_p4, %p460_p3 }
  0x38   :  { %p463_p6 = pnand %p462_p5, %p456_p2 }
  0x3a   :  { %105 = vrot.lane.b32.xlu1 %v554_v1, %s490_s8  ;;  %103 = vrot.lane.b32.xlu0 %v550_v0, %s490_s8 }
  0x3e   :  { %118 = vrot.lane.b32.xlu1 %v554_v1, %s491_s9  ;;  %116 = vrot.lane.b32.xlu0 %v550_v0, %s491_s9 }
  0x42   :  { %131 = vrot.lane.b32.xlu1 %v554_v1, %s492_s10  ;;  %129 = vrot.lane.b32.xlu0 %v550_v0, %s492_s10 }
  0x46   :  { %144 = vrot.lane.b32.xlu1 %v554_v1, %s493_s11  ;;  %142 = vrot.lane.b32.xlu0 %v550_v0, %s493_s11 }
  0x4a   :  { %157 = vrot.lane.b32.xlu1 %v554_v1, %s494_s12  ;;  %155 = vrot.lane.b32.xlu0 %v550_v0, %s494_s12 }
  0x4e   :  { %170 = vrot.lane.b32.xlu1 %v554_v1, %s495_s13  ;;  %168 = vrot.lane.b32.xlu0 %v550_v0, %s495_s13 }
  0x52   :  { %183 = vrot.lane.b32.xlu1 %v554_v1, %s496_s14  ;;  %181 = vrot.lane.b32.xlu0 %v550_v0, %s496_s14 }
  0x56   :  { %196 = vrot.lane.b32.xlu1 %v554_v1, %s497_s15  ;;  %194 = vrot.lane.b32.xlu0 %v550_v0, %s497_s15 }
  0x5a   :  { %209 = vrot.lane.b32.xlu1 %v554_v1, %s498_s16  ;;  %207 = vrot.lane.b32.xlu0 %v550_v0, %s498_s16 }
  0x5e   :  { %222 = vrot.lane.b32.xlu1 %v554_v1, %s499_s17  ;;  %220 = vrot.lane.b32.xlu0 %v550_v0, %s499_s17 }
  0x62   :  { %235 = vrot.lane.b32.xlu1 %v554_v1, %s500_s18  ;;  %233 = vrot.lane.b32.xlu0 %v550_v0, %s500_s18 }
  0x66   :  { %248 = vrot.lane.b32.xlu1 %v554_v1, %s501_s19  ;;  %246 = vrot.lane.b32.xlu0 %v550_v0, %s501_s19 }
  0x6a   :  { %261 = vrot.lane.b32.xlu1 %v554_v1, %s502_s20  ;;  %259 = vrot.lane.b32.xlu0 %v550_v0, %s502_s20 }
  0x6e   :  { %274 = vrot.lane.b32.xlu1 %v554_v1, %s503_s21  ;;  %272 = vrot.lane.b32.xlu0 %v550_v0, %s503_s21 }
  0x72   :  { %287 = vrot.lane.b32.xlu1 %v554_v1, %s504_s22  ;;  %285 = vrot.lane.b32.xlu0 %v550_v0, %s504_s22 }
  0x76   :  { %300 = vrot.lane.b32.xlu1 %v554_v1, %s505_s23  ;;  %298 = vrot.lane.b32.xlu0 %v550_v0, %s505_s23 }
  0x7a   :  { %313 = vrot.lane.b32.xlu1 %v554_v1, %s506_s24  ;;  %311 = vrot.lane.b32.xlu0 %v550_v0, %s506_s24 }
  0x7e   :  { %326 = vrot.lane.b32.xlu1 %v554_v1, %s507_s25  ;;  %324 = vrot.lane.b32.xlu0 %v550_v0, %s507_s25 }
  0x82   :  { %339 = vrot.lane.b32.xlu1 %v554_v1, %s508_s26  ;;  %337 = vrot.lane.b32.xlu0 %v550_v0, %s508_s26 }
  0x98   :  { %v52_v2 = vpop.permute.xlu1 %51  ;;  %v39_v3 = vpop.permute.xlu0 %38 }
  0x9c   :  { %v54_v4 = vpop.permute.xlu1 %53  ;;  %v41_v5 = vpop.permute.xlu0 %40 }
  0x9d   :  { %v56_v26 = vsel %vm55_vm0, %v52_v2, %v54_v4  ;;  %v57_v27 = vsel %vm55_vm0, %v54_v4, %v52_v2  ;;  %v45_v28 = vsel %vm44_vm1, %v39_v3, %v41_v5  ;;  %v46_v29 = vsel %vm44_vm1, %v41_v5, %v39_v3 }
  0x9e   :  { %vm58_vm5 = vcmp.ge.f32.partialorder %v57_v27, %v550_v0  ;;  %vm59_vm6 = vcmp.ge.f32.partialorder %v56_v26, %v554_v1  ;;  %vm47_vm7 = vcmp.ge.f32.partialorder %v46_v29, %v550_v0  ;;  %vm48_vm8 = vcmp.ge.f32.partialorder %v45_v28, %v554_v1 }
  0x9f   :  { %v60_v37 = vsel %vm58_vm5, 4194304, %v509_v36  ;;  %v61_v38 = vsel %vm59_vm6, 4194304, %v509_v36  ;;  %v49_v41 = vsel %vm47_vm7, 8388608, %v509_v36  ;;  %v50_v42 = vsel %vm48_vm8, 8388608, %v509_v36 }
  0xa0   :  { %v67_v6 = vpop.permute.xlu1 %66  ;;  %v65_v7 = vpop.permute.xlu0 %64  ;;  %vm159_vm1 = vcmp.lt.s32.totalorder %v615_v21, 14  ;;  %v62_v49 = vadd.s32 %v60_v37, %v49_v41  ;;  %v63_v50 = vadd.s32 %v61_v38, %v50_v42  ;;  %vm185_vm5 = vcmp.lt.s32.totalorder %v615_v21, 1 }
  0xa1   :  { %v69_v32 = vsel %vm68_vm2, %v65_v7, %v67_v6  ;;  %v70_v33 = vsel %vm68_vm2, %v67_v6, %v65_v7  ;;  %vm172_vm2 = vcmp.lt.s32.totalorder %v615_v21, 2  ;;  %vm198_vm8 = vcmp.lt.s32.totalorder %v615_v21, 127 }
  0xa2   :  { %vm71_vm13 = vcmp.ge.f32.partialorder %v70_v33, %v550_v0  ;;  %vm72_vm14 = vcmp.ge.f32.partialorder %v69_v32, %v554_v1 }
  0xa3   :  { %v73_v45 = vsel %vm71_vm13, 2097152, %v509_v36  ;;  %v74_v46 = vsel %vm72_vm14, 2097152, %v509_v36  ;;  %vm211_vm13 = vcmp.lt.s32.totalorder %v615_v21, 126 }
  0xa4   :  { %v80_v8 = vpop.permute.xlu1 %79  ;;  %v78_v9 = vpop.permute.xlu0 %77  ;;  %v75_v57 = vadd.s32 %v73_v45, %v62_v49  ;;  %v76_v58 = vadd.s32 %v74_v46, %v63_v50 }
  0xa5   :  { %v82_v34 = vsel %vm81_vm3, %v78_v9, %v80_v8  ;;  %v83_v35 = vsel %vm81_vm3, %v80_v8, %v78_v9 }
  0xa6   :  { %vm84_vm15 = vcmp.ge.f32.partialorder %v83_v35, %v550_v0  ;;  %vm85_vm0 = vcmp.ge.f32.partialorder %v82_v34, %v554_v1 }
  0xa7   :  { %v86_v53 = vsel %vm84_vm15, 1048576, %v509_v36  ;;  %v87_v54 = vsel %vm85_vm0, 1048576, %v509_v36  ;;  %vm224_vm15 = vcmp.lt.s32.totalorder %v615_v21, 114 }
  0xa8   :  { %v93_v10 = vpop.permute.xlu1 %92  ;;  %v91_v11 = vpop.permute.xlu0 %90  ;;  %v88_v63 = vadd.s32 %v86_v53, %v75_v57  ;;  %v89_v2 = vadd.s32 %v87_v54, %v76_v58 }
  0xa9   :  { %v95_v43 = vsel %vm94_vm4, %v91_v11, %v93_v10  ;;  %v96_v44 = vsel %vm94_vm4, %v93_v10, %v91_v11 }
  0xaa   :  { %vm97_vm3 = vcmp.ge.f32.partialorder %v96_v44, %v550_v0  ;;  %vm98_vm4 = vcmp.ge.f32.partialorder %v95_v43, %v554_v1 }
  0xab   :  { %v99_v59 = vsel %vm97_vm3, 524288, %v509_v36  ;;  %v100_v60 = vsel %vm98_vm4, 524288, %v509_v36  ;;  %vm237_vm3 = vcmp.lt.s32.totalorder %v615_v21, 113 }
  0xac   :  { %v106_v12 = vpop.permute.xlu1 %105  ;;  %v104_v13 = vpop.permute.xlu0 %103  ;;  %v101_v9 = vadd.s32 %v99_v59, %v88_v63  ;;  %v102_v10 = vadd.s32 %v100_v60, %v89_v2 }
  0xad   :  { %v108_v47 = vsel %vm107_vm9, %v104_v13, %v106_v12  ;;  %v109_v48 = vsel %vm107_vm9, %v106_v12, %v104_v13 }
  0xae   :  { %vm110_vm6 = vcmp.ge.f32.partialorder %v109_v48, %v550_v0  ;;  %vm111_vm7 = vcmp.ge.f32.partialorder %v108_v47, %v554_v1 }
  0xaf   :  { %v112_v5 = vsel %vm110_vm6, 262144, %v509_v36  ;;  %v113_v6 = vsel %vm111_vm7, 262144, %v509_v36  ;;  %vm250_vm6 = vcmp.lt.s32.totalorder %v615_v21, 112 }
  0xb0   :  { %v602_v14 = vpop.permute.xlu1 %118  ;;  %v604_v15 = vpop.permute.xlu0 %116 }
  0xb1   :  { %v121_v55 = vsel %vm120_vm10, %v604_v15, %v602_v14  ;;  %v122_v56 = vsel %vm120_vm10, %v602_v14, %v604_v15  ;;  %v114_v15 = vadd.s32 %v112_v5, %v101_v9 }
  0xb2   :  { %vm123_vm9 = vcmp.ge.f32.partialorder %v122_v56, %v550_v0  ;;  %vm124_vm10 = vcmp.ge.f32.partialorder %v121_v55, %v554_v1 }
  0xb3   :  { %v125_v11 = vsel %vm123_vm9, 131072, %v509_v36  ;;  %v126_v12 = vsel %vm124_vm10, 131072, %v509_v36  ;;  %vm263_vm9 = vcmp.lt.s32.totalorder %v615_v21, 111 }
  0xb4   :  { %v606_v16 = vpop.permute.xlu1 %131  ;;  %v608_v17 = vpop.permute.xlu0 %129 }
  0xb5   :  { %v134_v61 = vsel %vm133_vm11, %v608_v17, %v606_v16  ;;  %v135_v62 = vsel %vm133_vm11, %v606_v16, %v608_v17  ;;  %v115_v16 = vadd.s32 %v113_v6, %v102_v10 }
  0xb6   :  { %vm136_vm11 = vcmp.ge.f32.partialorder %v135_v62, %v550_v0  ;;  %vm137_vm14 = vcmp.ge.f32.partialorder %v134_v61, %v554_v1 }
  0xb7   :  { %v139_v26 = vsel %vm137_vm14, 65536, %v509_v36  ;;  %v128_v28 = vadd.s32 %v126_v12, %v115_v16 }
  0xb8   :  { %v610_v19 = vpop.permute.xlu1 %144  ;;  %v612_v20 = vpop.permute.xlu0 %142 }
  0xb9   :  { %v147_v7 = vsel %vm146_vm12, %v612_v20, %v610_v19  ;;  %v148_v8 = vsel %vm146_vm12, %v610_v19, %v612_v20  ;;  %v138_v20 = vsel %vm136_vm11, 65536, %v509_v36  ;;  %v141_v34 = vadd.s32 %v139_v26, %v128_v28 }
  0xba   :  { %vm149_vm12 = vcmp.ge.f32.partialorder %v148_v8, %v550_v0  ;;  %vm150_vm0 = vcmp.ge.f32.partialorder %v147_v7, %v554_v1  ;;  %vm276_vm11 = vcmp.lt.s32.totalorder %v615_v21, 110 }
  0xbb   :  { %v151_v29 = vsel %vm149_vm12, 32768, %v509_v36  ;;  %v152_v32 = vsel %vm150_vm0, 32768, %v509_v36  ;;  %vm289_vm12 = vcmp.lt.s32.totalorder %v615_v21, 98 }
  0xbc   :  { %v617_v22 = vpop.permute.xlu1 %157  ;;  %v619_v23 = vpop.permute.xlu0 %155  ;;  %v154_v43 = vadd.s32 %v152_v32, %v141_v34  ;;  %v350_v34 = vld [vmem:[#allocation2] sm:$0x3] }
  0xbd   :  { %v160_v13 = vsel %vm159_vm1, %v619_v23, %v617_v22  ;;  %v161_v14 = vsel %vm159_vm1, %v617_v22, %v619_v23  ;;  %v127_v23 = vadd.s32 %v125_v11, %v114_v15 }
  0xbe   :  { %vm162_vm1 = vcmp.ge.f32.partialorder %v161_v14, %v550_v0  ;;  %vm163_vm4 = vcmp.ge.f32.partialorder %v160_v13, %v554_v1 }
  0xbf   :  { %v164_v38 = vsel %vm162_vm1, 16384, %v509_v36  ;;  %v165_v41 = vsel %vm163_vm4, 16384, %v509_v36  ;;  %vm302_vm1 = vcmp.lt.s32.totalorder %v615_v21, 97 }
  0xc0   :  { %v623_v24 = vpop.permute.xlu1 %170  ;;  %v625_v25 = vpop.permute.xlu0 %168  ;;  %v167_v47 = vadd.s32 %v165_v41, %v154_v43 }
  0xc1   :  { %v173_v27 = vsel %vm172_vm2, %v625_v25, %v623_v24  ;;  %v174_v22 = vsel %vm172_vm2, %v623_v24, %v625_v25  ;;  %v140_v25 = vadd.s32 %v138_v20, %v127_v23 }
  0xc2   :  { %vm175_vm2 = vcmp.ge.f32.partialorder %v174_v22, %v550_v0  ;;  %vm176_vm7 = vcmp.ge.f32.partialorder %v173_v27, %v554_v1 }
  0xc3   :  { %v177_v44 = vsel %vm175_vm2, 8192, %v509_v36  ;;  %v178_v45 = vsel %vm176_vm7, 8192, %v509_v36  ;;  %vm315_vm7 = vcmp.lt.s32.totalorder %v615_v21, 96 }
  0xc4   :  { %v630_v30 = vpop.permute.xlu1 %183  ;;  %v632_v31 = vpop.permute.xlu0 %181  ;;  %v180_v55 = vadd.s32 %v178_v45, %v167_v47 }
  0xc5   :  { %v186_v33 = vsel %vm185_vm5, %v632_v31, %v630_v30  ;;  %v187_v24 = vsel %vm185_vm5, %v630_v30, %v632_v31  ;;  %v153_v31 = vadd.s32 %v151_v29, %v140_v25 }
  0xc6   :  { %vm188_vm5 = vcmp.ge.f32.partialorder %v187_v24, %v550_v0  ;;  %vm189_vm10 = vcmp.ge.f32.partialorder %v186_v33, %v554_v1 }
  0xc7   :  { %v190_v50 = vsel %vm188_vm5, 4096, %v509_v36  ;;  %v191_v53 = vsel %vm189_vm10, 4096, %v509_v36 }
  0xc8   :  { %v646_v39 = vpop.permute.xlu1 %196  ;;  %v648_v40 = vpop.permute.xlu0 %194  ;;  %v193_v61 = vadd.s32 %v191_v53, %v180_v55 }
  0xc9   :  { %v199_v42 = vsel %vm198_vm8, %v648_v40, %v646_v39  ;;  %v200_v30 = vsel %vm198_vm8, %v646_v39, %v648_v40  ;;  %v166_v40 = vadd.s32 %v164_v38, %v153_v31 }
  0xca   :  { %vm201_vm8 = vcmp.ge.f32.partialorder %v199_v42, %v550_v0  ;;  %vm202_vm14 = vcmp.ge.f32.partialorder %v200_v30, %v554_v1 }
  0xcb   :  { %v203_v56 = vsel %vm201_vm8, 2048, %v509_v36  ;;  %v204_v57 = vsel %vm202_vm14, 2048, %v509_v36  ;;  %vm328_vm8 = vcmp.lt.s32.totalorder %v615_v21, 95 }
  0xcc   :  { %v669_v51 = vpop.permute.xlu1 %209  ;;  %v671_v52 = vpop.permute.xlu0 %207  ;;  %v206_v7 = vadd.s32 %v204_v57, %v193_v61 }
  0xcd   :  { %v212_v46 = vsel %vm211_vm13, %v671_v52, %v669_v51  ;;  %v213_v39 = vsel %vm211_vm13, %v669_v51, %v671_v52  ;;  %v179_v52 = vadd.s32 %v177_v44, %v166_v40  ;;  %v354_v44 = vshrl.u32 %v42_v18, 7 }
  0xce   :  { %vm214_vm13 = vcmp.ge.f32.partialorder %v212_v46, %v550_v0  ;;  %vm215_vm0 = vcmp.ge.f32.partialorder %v213_v39, %v554_v1 }
  0xcf   :  { %v192_v60 = vadd.s32 %v190_v50, %v179_v52  ;;  %v216_v2 = vsel %vm214_vm13, 1024, %v509_v36  ;;  %v355_v52 = vsub.s32 0, %v354_v44  ;;  %v359_v55 = vsub.s32 1, %v354_v44 }
  0xd0   :  { %v699_v3 = vpop.permute.xlu1 %222  ;;  %v701_v4 = vpop.permute.xlu0 %220 }
  0xd1   :  { %v225_v54 = vsel %vm224_vm15, %v701_v4, %v699_v3  ;;  %v226_v51 = vsel %vm224_vm15, %v699_v3, %v701_v4  ;;  %v217_v3 = vsel %vm215_vm0, 1024, %v509_v36  ;;  %v205_v6 = vadd.s32 %v203_v56, %v192_v60 }
  0xd2   :  { %vm227_vm15 = vcmp.ge.f32.partialorder %v225_v54, %v550_v0  ;;  %vm228_vm4 = vcmp.ge.f32.partialorder %v226_v51, %v554_v1  ;;  %v219_v13 = vadd.s32 %v217_v3, %v206_v7  ;;  %vm351_vm0 = vcmp.ne.s32.totalorder %v350_v34, 0 }
  0xd3   :  { %v229_v8 = vsel %vm227_vm15, 512, %v509_v36  ;;  %v230_v9 = vsel %vm228_vm4, 512, %v509_v36  ;;  %v218_v12 = vadd.s32 %v216_v2, %v205_v6  ;;  %v352_v60 = vsel %vm351_vm0, 1, %v509_v36 }
  0xd4   :  { %v236_v17 = vpop.permute.xlu1 %235  ;;  %v234_v19 = vpop.permute.xlu0 %233  ;;  %v232_v27 = vadd.s32 %v230_v9, %v219_v13  ;;  %v356_v7 = vrot.slane %v352_v60, %v355_v52 }
  0xd5   :  { %v238_v58 = vsel %vm237_vm3, %v234_v19, %v236_v17  ;;  %v239_v59 = vsel %vm237_vm3, %v236_v17, %v234_v19  ;;  %v231_v26 = vadd.s32 %v229_v8, %v218_v12  ;;  %v360_v8 = vrot.slane %v352_v60, %v359_v55 }
  0xd6   :  { %vm240_vm3 = vcmp.ge.f32.partialorder %v238_v58, %v550_v0  ;;  %vm241_vm2 = vcmp.ge.f32.partialorder %v239_v59, %v554_v1 }
  0xd7   :  { %v242_v16 = vsel %vm240_vm3, 256, %v509_v36  ;;  %v243_v17 = vsel %vm241_vm2, 256, %v509_v36  ;;  %vm341_vm2 = vcmp.lt.s32.totalorder %v615_v21, 94 }
  0xd8   :  { %v249_v35 = vpop.permute.xlu1 %248  ;;  %v247_v37 = vpop.permute.xlu0 %246  ;;  %v244_v32 = vadd.s32 %v242_v16, %v231_v26  ;;  %v245_v33 = vadd.s32 %v243_v17, %v232_v27 }
  0xd9   :  { %v251_v4 = vsel %vm250_vm6, %v247_v37, %v249_v35  ;;  %v252_v5 = vsel %vm250_vm6, %v249_v35, %v247_v37 }
  0xda   :  { %vm253_vm6 = vcmp.ge.f32.partialorder %v251_v4, %v550_v0  ;;  %vm254_vm5 = vcmp.ge.f32.partialorder %v252_v5, %v554_v1 }
  0xdb   :  { %v255_v22 = vsel %vm253_vm6, 128, %v509_v36  ;;  %v256_v23 = vsel %vm254_vm5, 128, %v509_v36 }
  0xdc   :  { %v262_v48 = vpop.permute.xlu1 %261  ;;  %v260_v49 = vpop.permute.xlu0 %259  ;;  %v257_v42 = vadd.s32 %v255_v22, %v244_v32  ;;  %v258_v30 = vadd.s32 %v256_v23, %v245_v33 }
  0xdd   :  { %v264_v10 = vsel %vm263_vm9, %v260_v49, %v262_v48  ;;  %v265_v11 = vsel %vm263_vm9, %v262_v48, %v260_v49 }
  0xde   :  { %vm266_vm9 = vcmp.ge.f32.partialorder %v264_v10, %v550_v0  ;;  %vm267_vm10 = vcmp.ge.f32.partialorder %v265_v11, %v554_v1 }
  0xdf   :  { %v268_v35 = vsel %vm266_vm9, 64, %v509_v36  ;;  %v269_v37 = vsel %vm267_vm10, 64, %v509_v36  ;;  %vm361_vm10 = vcmp.eq.s32.totalorder %v356_v7, 1 }
  0xe0   :  { %v275_v62 = vpop.permute.xlu1 %274  ;;  %v273_v63 = vpop.permute.xlu0 %272  ;;  %v270_v45 = vadd.s32 %v268_v35, %v257_v42  ;;  %v271_v46 = vadd.s32 %v269_v37, %v258_v30 }
  0xe1   :  { %v277_v19 = vsel %vm276_vm11, %v273_v63, %v275_v62  ;;  %v278_v20 = vsel %vm276_vm11, %v275_v62, %v273_v63 }
  0xe2   :  { %vm279_vm11 = vcmp.ge.f32.partialorder %v277_v19, %v550_v0  ;;  %vm280_vm14 = vcmp.ge.f32.partialorder %v278_v20, %v554_v1 }
  0xe3   :  { %v281_v31 = vsel %vm279_vm11, 32, %v509_v36  ;;  %v282_v43 = vsel %vm280_vm14, 32, %v509_v36 }
  0xe4   :  { %v288_v14 = vpop.permute.xlu1 %287  ;;  %v286_v15 = vpop.permute.xlu0 %285  ;;  %v283_v53 = vadd.s32 %v281_v31, %v270_v45  ;;  %v284_v18 = vadd.s32 %v282_v43, %v271_v46 }
  0xe5   :  { %v290_v28 = vsel %vm289_vm12, %v286_v15, %v288_v14  ;;  %v291_v29 = vsel %vm289_vm12, %v288_v14, %v286_v15 }
  0xe6   :  { %vm292_vm12 = vcmp.ge.f32.partialorder %v290_v28, %v550_v0  ;;  %vm293_vm13 = vcmp.ge.f32.partialorder %v291_v29, %v554_v1 }
  0xe7   :  { %v294_v47 = vsel %vm292_vm12, 16, %v509_v36  ;;  %v295_v48 = vsel %vm293_vm13, 16, %v509_v36 }
  0xe8   :  { %v301_v24 = vpop.permute.xlu1 %300  ;;  %v299_v25 = vpop.permute.xlu0 %298  ;;  %v296_v56 = vadd.s32 %v294_v47, %v283_v53  ;;  %v297_v57 = vadd.s32 %v295_v48, %v284_v18 }
  0xe9   :  { %v303_v38 = vsel %vm302_vm1, %v299_v25, %v301_v24  ;;  %v304_v41 = vsel %vm302_vm1, %v301_v24, %v299_v25 }
  0xea   :  { %vm305_vm15 = vcmp.ge.f32.partialorder %v303_v38, %v550_v0  ;;  %vm306_vm4 = vcmp.ge.f32.partialorder %v304_v41, %v554_v1 }
  0xeb   :  { %v307_v54 = vsel %vm305_vm15, 8, %v509_v36  ;;  %v308_v51 = vsel %vm306_vm4, 8, %v509_v36 }
  0xec   :  { %v314_v39 = vpop.permute.xlu1 %313  ;;  %v312_v40 = vpop.permute.xlu0 %311  ;;  %v309_v3 = vadd.s32 %v307_v54, %v296_v56  ;;  %v310_v4 = vadd.s32 %v308_v51, %v297_v57 }
  0xed   :  { %v316_v49 = vsel %vm315_vm7, %v312_v40, %v314_v39  ;;  %v317_v50 = vsel %vm315_vm7, %v314_v39, %v312_v40 }
  0xee   :  { %vm318_vm1 = vcmp.ge.f32.partialorder %v316_v49, %v550_v0  ;;  %vm319_vm3 = vcmp.ge.f32.partialorder %v317_v50, %v554_v1 }
  0xef   :  { %v320_v61 = vsel %vm318_vm1, 4, %v509_v36  ;;  %v321_v62 = vsel %vm319_vm3, 4, %v509_v36 }
  0xf0   :  { %v327_v58 = vpop.permute.xlu1 %326  ;;  %v325_v59 = vpop.permute.xlu0 %324  ;;  %v322_v9 = vadd.s32 %v320_v61, %v309_v3  ;;  %v323_v10 = vadd.s32 %v321_v62, %v310_v4 }
  0xf1   :  { %v329_v63 = vsel %vm328_vm8, %v325_v59, %v327_v58  ;;  %v330_v2 = vsel %vm328_vm8, %v327_v58, %v325_v59  ;;  %vm362_vm8 = vcmp.eq.s32.totalorder %v360_v8, 1 }
  0xf2   :  { %vm331_vm7 = vcmp.ge.f32.partialorder %v329_v63, %v550_v0  ;;  %vm332_vm6 = vcmp.ge.f32.partialorder %v330_v2, %v554_v1 }
  0xf3   :  { %v333_v5 = vsel %vm331_vm7, 2, %v509_v36  ;;  %v334_v6 = vsel %vm332_vm6, 2, %v509_v36 }
  0xf4   :  { %v340_v11 = vpop.permute.xlu1 %339  ;;  %v338_v12 = vpop.permute.xlu0 %337  ;;  %v335_v15 = vadd.s32 %v333_v5, %v322_v9  ;;  %v336_v16 = vadd.s32 %v334_v6, %v323_v10 }
  0xf5   :  { %v342_v13 = vsel %vm341_vm2, %v338_v12, %v340_v11  ;;  %v343_v14 = vsel %vm341_vm2, %v340_v11, %v338_v12 }
  0xf6   :  { %vm344_vm5 = vcmp.ge.f32.partialorder %v342_v13, %v550_v0  ;;  %vm345_vm9 = vcmp.ge.f32.partialorder %v343_v14, %v554_v1 }
  0xf7   :  { %v346_v17 = vsel %vm344_vm5, 1, %v509_v36  ;;  %v347_v19 = vsel %vm345_vm9, 1, %v509_v36 }
  0xf8   :  { %v348_v20 = vadd.s32 %v346_v17, %v335_v15  ;;  %v349_v26 = vadd.s32 %v347_v19, %v336_v16 }
  0xfa   :  { %v363_v27 = vsel %vm361_vm10, %v348_v20, 0  ;;  %v364_v21 = vsel %vm362_vm8, %v349_v26, 0 }
  0xfb   :  { %365 = vst [vmem:[#allocation7] sm:$0xff] %v363_v27  ;;  %366 = vst [vmem:[#allocation7 + $0x8] sm:$0xff] %v364_v21 }
  0xfc   :  { %466 = shalt.err (!%p463_p6)
}
  0xfd   :  { %s467_s3 = scalar_lea.hbm %s894_s2, 256 }
  0xfe   :  { %p468_p7 = scmp.ne.s32.totalorder %s894_s2, %s467_s3  ;;  %p471_p8 = scmp.lt.u32.totalorder %s467_s3, %s894_s2 }
 0x100   :  { %p473_p9 = pnand %p471_p8, %p468_p7 }
 0x102   :  { %476 = shalt.err (!%p473_p9)
}
 0x103   :  { %376 = dma.vmem_to_hbm [thread:$0]  %s374_s28, 256, %s894_s2, [#allocation4]  }
 0x104   :  { %481 = dma.done.wait [#allocation4], 256  }
 0x105   :  { %482 = vsyncadd [#allocation4], 4294967040 }
 0x106   :  { %380 = vsyncpa [#allocation3], 1 }
 0x107   :  { %381 = vsyncpa [#allocation6], 1 }
 0x108   :  { %382 = vsyncpa [#allocation4], 1 }

</bundles_post_ra>
